<compile_context>
chip_gen: v7x
topology: tpu7x:2x2x1
jax: 0.10.0
libtpu: 0.0.40
codegen_flags: <defaults>
</compile_context>

<pallas_src>
import functools

import jax
import jax.numpy as jnp
from jax import lax
from jax.experimental import pallas as pl
from jax.experimental.pallas import tpu as pltpu


COMPUTE_DTYPE = jnp.bfloat16   # MXU-native operand dtype (f32 accumulation)


# ----------------------------------------------------------------- tile helpers
def _pick_tile(dim, candidates):
    for t in candidates:
        if t <= dim and dim % t == 0:
            return t
    return dim  # full dimension is always legal


def _row_tile(m):
    # capped so (tm x C f32) + (C x tn bf16) tiles fit default scoped VMEM everywhere
    return _pick_tile(m, (256, 128, 64, 32, 16, 8))


def _lane_tile(n):
    # 256-aligned candidates first (v6e/v7x 2x256x256 MXU); 128 kept for small dims
    return _pick_tile(n, (512, 256, 128))


def _pad_rows(x2d, multiple=8):
    """Zero-pad the row axis to a multiple of `multiple` (avoids full-M fallback)."""
    m = x2d.shape[0]
    pad = (-m) % multiple
    if pad:
        x2d = jnp.pad(x2d, ((0, pad), (0, 0)))
    return x2d, m


# ----------------------------------------------------------------- LN + Linear (+GELU)
def _ln_linear_kernel(x_ref, g_ref, b_ref, w_ref, bias_ref, o_ref, *, eps, activation):
    x = x_ref[...].astype(jnp.float32)                       # (tm, C)
    mu = jnp.mean(x, axis=-1, keepdims=True)
    xc = x - mu
    var = jnp.mean(xc * xc, axis=-1, keepdims=True)
    h = xc * lax.rsqrt(var + eps)
    h = h * g_ref[...].astype(jnp.float32) + b_ref[...].astype(jnp.float32)
    # bf16 operands into the MXU, f32 accumulation
    y = jnp.dot(h.astype(w_ref.dtype), w_ref[...],
                preferred_element_type=jnp.float32)
    y = y + bias_ref[...].astype(jnp.float32)
    if activation == "gelu":
        # TODO(synk): torch nn.GELU defaults to the exact erf form; tanh approx used here.
        y = jax.nn.gelu(y, approximate=True)
    o_ref[...] = y.astype(o_ref.dtype)


def ln_linear(x2d, gamma, beta, w, bias, *, activation=None, eps=1e-5,
              out_dtype=COMPUTE_DTYPE):
    """out = [GELU]( LayerNorm(x2d) @ w + bias ), LN fused into the matmul."""
    x2d, m_orig = _pad_rows(x2d)
    m, c = x2d.shape
    n = w.shape[1]
    tm = _row_tile(m)
    tn = _lane_tile(n)
    out = pl.pallas_call(
        functools.partial(_ln_linear_kernel, eps=eps, activation=activation),
        out_shape=jax.ShapeDtypeStruct((m, n), out_dtype),
        grid_spec=pltpu.PrefetchScalarGridSpec(
            num_scalar_prefetch=0,
            grid=(m // tm, n // tn),
            in_specs=[
                pl.BlockSpec((tm, c), lambda i, j: (i, 0)),
                pl.BlockSpec((1, c), lambda i, j: (0, 0)),
                pl.BlockSpec((1, c), lambda i, j: (0, 0)),
                pl.BlockSpec((c, tn), lambda i, j: (0, j)),
                pl.BlockSpec((1, tn), lambda i, j: (0, j)),
            ],
            out_specs=pl.BlockSpec((tm, tn), lambda i, j: (i, j)),
        ),
        compiler_params=pltpu.CompilerParams(
            dimension_semantics=("parallel", "parallel")),
    )(x2d,
      gamma.reshape(1, c).astype(jnp.float32),
      beta.reshape(1, c).astype(jnp.float32),
      w.astype(COMPUTE_DTYPE),
      bias.reshape(1, n).astype(jnp.float32))
    return out[:m_orig]


# ----------------------------------------------------------------- Linear + residual + drop-path
def _linear_residual_kernel(a_ref, w_ref, bias_ref, res_ref, sc_ref, o_ref):
    y = jnp.dot(a_ref[...], w_ref[...], preferred_element_type=jnp.float32)
    y = y + bias_ref[...].astype(jnp.float32)
    # drop-path scale applied in f32, residual add fused into the epilogue
    out = res_ref[...].astype(jnp.float32) + sc_ref[...] * y
    o_ref[...] = out.astype(o_ref.dtype)


def linear_residual(a2d, w, bias, res2d, row_scales):
    """out[r, :] = res2d[r, :] + row_scales[r] * (a2d @ w + bias)[r, :]"""
    a2d, m_orig = _pad_rows(a2d)
    res2d, _ = _pad_rows(res2d)
    row_scales, _ = _pad_rows(row_scales.reshape(-1, 1).astype(jnp.float32))
    m, k = a2d.shape
    n = w.shape[1]
    tm = _row_tile(m)
    tn = _lane_tile(n)
    out = pl.pallas_call(
        _linear_residual_kernel,
        out_shape=jax.ShapeDtypeStruct((m, n), res2d.dtype),
        grid_spec=pltpu.PrefetchScalarGridSpec(
            num_scalar_prefetch=0,
            grid=(m // tm, n // tn),
            in_specs=[
                pl.BlockSpec((tm, k), lambda i, j: (i, 0)),
                pl.BlockSpec((k, tn), lambda i, j: (0, j)),
                pl.BlockSpec((1, tn), lambda i, j: (0, j)),
                pl.BlockSpec((tm, tn), lambda i, j: (i, j)),
                pl.BlockSpec((tm, 1), lambda i, j: (i, 0)),
            ],
            out_specs=pl.BlockSpec((tm, tn), lambda i, j: (i, j)),
        ),
        compiler_params=pltpu.CompilerParams(
            dimension_semantics=("parallel", "parallel")),
    )(a2d.astype(COMPUTE_DTYPE),
      w.astype(COMPUTE_DTYPE),
      bias.reshape(1, n).astype(jnp.float32),
      res2d, row_scales)
    return out[:m_orig]


# ----------------------------------------------------------------- part attention
_TRANS_B = (((1,), (1,)), ((), ()))   # contract last dims: q @ k^T


def _part_attention_kernel(qkv_ref, m_ref, o_ref, *, num_heads, scale):
    qkv = qkv_ref[0]                                       # (N, 3C), compute dtype
    c3 = qkv.shape[1]
    c = c3 // 3
    hd = c // num_heads
    mask = m_ref[...].astype(jnp.float32)                  # (N, N) 0/1
    outs = []
    for h in range(num_heads):                             # static per-head column slices
        qh = qkv[:, h * hd:(h + 1) * hd]
        kh = qkv[:, c + h * hd: c + (h + 1) * hd]
        vh = qkv[:, 2 * c + h * hd: 2 * c + (h + 1) * hd]
        s = lax.dot_general(qh, kh, _TRANS_B,
                            preferred_element_type=jnp.float32) * scale
        s = jnp.where(mask != 0.0, s, jnp.float32(-1000.0))  # masked_fill(~mask, -1000)
        s = s - jnp.max(s, axis=-1, keepdims=True)
        e = jnp.exp(s)
        p = e * pl.reciprocal(jnp.sum(e, axis=-1, keepdims=True), approx=True)
        p = p * mask                                        # torch.mul(attn, mask)
        oh = jnp.dot(p.astype(qkv.dtype), vh, preferred_element_type=jnp.float32)
        outs.append(oh)
    # lane-dense (N, C) context write; replaces the HBM transpose(0,2,1,3)+reshape
    o_ref[0] = jnp.concatenate(outs, axis=-1).astype(o_ref.dtype)


def part_attention(qkv3, mask, *, num_heads, scale, out_dtype=COMPUTE_DTYPE):
    """qkv3: (B, N, 3C) laid out as torch's [q heads..., k heads..., v heads...]."""
    bsz, n, c3 = qkv3.shape
    c = c3 // 3
    # TODO(synk): whole-sequence blocks per batch; very long N would need a
    # flash-style query/key-tiled variant.
    kern = functools.partial(_part_attention_kernel, num_heads=num_heads,
                             scale=float(scale))
    return pl.pallas_call(
        kern,
        out_shape=jax.ShapeDtypeStruct((bsz, n, c), out_dtype),
        grid_spec=pltpu.PrefetchScalarGridSpec(
            num_scalar_prefetch=0,
            grid=(bsz,),
            in_specs=[
                pl.BlockSpec((1, n, c3), lambda b: (b, 0, 0)),
                pl.BlockSpec((n, n), lambda b: (0, 0)),
            ],
            out_specs=pl.BlockSpec((1, n, c), lambda b: (b, 0, 0)),
        ),
        compiler_params=pltpu.CompilerParams(dimension_semantics=("parallel",)),
    )(qkv3, mask.astype(jnp.float32))


# ----------------------------------------------------------------- drop-path scales
def make_drop_path_scales(key, batch, drop_prob, training):
    """torch drop_path: keep_b ~ Bernoulli(keep_prob); scale_b = keep_b / keep_prob."""
    if drop_prob <= 0.0 or not training:
        return jnp.ones((batch,), jnp.float32)
    keep_prob = 1.0 - float(drop_prob)
    keep = jax.random.bernoulli(key, keep_prob, (batch,))
    return keep.astype(jnp.float32) / jnp.float32(keep_prob)


# ----------------------------------------------------------------- block wrapper
def init_params(key, dim, num_heads, mlp_ratio=4.0, qkv_bias=False, dtype=jnp.float32):
    hidden = int(dim * mlp_ratio)
    ks = jax.random.split(key, 8)
    w = lambda kk, shape: (0.1 * jax.random.normal(kk, shape)).astype(dtype)
    return dict(
        norm1_g=jnp.ones((dim,), dtype), norm1_b=jnp.zeros((dim,), dtype),
        qkv_w=w(ks[0], (dim, 3 * dim)),
        qkv_b=(w(ks[1], (3 * dim,)) if qkv_bias else jnp.zeros((3 * dim,), dtype)),
        proj_w=w(ks[2], (dim, dim)), proj_b=w(ks[3], (dim,)),
        norm2_g=jnp.ones((dim,), dtype), norm2_b=jnp.zeros((dim,), dtype),
        fc1_w=w(ks[4], (dim, hidden)), fc1_b=w(ks[5], (hidden,)),
        fc2_w=w(ks[6], (hidden, dim)), fc2_b=w(ks[7], (dim,)),
    )


def part_attention_block_forward(params, x, mask, *, num_heads, qk_scale=None,
                                 scales1=None, scales2=None):
    """Pallas forward of part_Attention_Block. x: (B, N, C); mask: (N, N) 0/1."""
    bsz, n, c = x.shape
    hd = c // num_heads
    scale = qk_scale if qk_scale is not None else hd ** -0.5
    if scales1 is None:
        scales1 = jnp.ones((bsz,), jnp.float32)
    if scales2 is None:
        scales2 = jnp.ones((bsz,), jnp.float32)

    x2d = x.reshape(bsz * n, c).astype(jnp.float32)
    row_s1 = jnp.broadcast_to(scales1[:, None], (bsz, n)).reshape(bsz * n)
    row_s2 = jnp.broadcast_to(scales2[:, None], (bsz, n)).reshape(bsz * n)

    # ---- attention branch: x + DropPath(proj(part_attn(norm1(x), mask)))
    qkv = ln_linear(x2d, params["norm1_g"], params["norm1_b"],
                    params["qkv_w"], params["qkv_b"])                 # (M, 3C) bf16
    ctx = part_attention(qkv.reshape(bsz, n, 3 * c), mask,
                         num_heads=num_heads, scale=scale)            # (B, N, C) bf16
    x2d = linear_residual(ctx.reshape(bsz * n, c), params["proj_w"],
                          params["proj_b"], x2d, row_s1)              # (M, C) f32
    # TODO(synk): attn_drop / proj_drop / Mlp dropout only supported at rate 0.0
    # (the module defaults).

    # ---- MLP branch: x + DropPath(fc2(GELU(fc1(norm2(x)))))
    h = ln_linear(x2d, params["norm2_g"], params["norm2_b"],
                  params["fc1_w"], params["fc1_b"], activation="gelu")  # (M, hidden) bf16
    x2d = linear_residual(h, params["fc2_w"], params["fc2_b"], x2d, row_s2)
    return x2d.reshape(bsz, n, c).astype(x.dtype)


# ----------------------------------------------------------------- pure-JAX reference
def reference_forward(params, x, mask, *, num_heads, qk_scale=None,
                      scales1=None, scales2=None):
    bsz, n, c = x.shape
    hd = c // num_heads
    scale = qk_scale if qk_scale is not None else hd ** -0.5

    def ln(z, g, b, eps=1e-5):
        mu = jnp.mean(z, axis=-1, keepdims=True)
        var = jnp.mean((z - mu) ** 2, axis=-1, keepdims=True)
        return (z - mu) * lax.rsqrt(var + eps) * g + b

    h = ln(x, params["norm1_g"], params["norm1_b"])
    qkv = h @ params["qkv_w"] + params["qkv_b"]
    qkv = qkv.reshape(bsz, n, 3, num_heads, hd).transpose(2, 0, 3, 1, 4)
    q, k, v = qkv[0], qkv[1], qkv[2]
    attn = jnp.einsum("bhqd,bhkd->bhqk", q, k) * scale
    m = mask.astype(attn.dtype)
    attn = jnp.where(m != 0.0, attn, -1000.0)
    attn = jax.nn.softmax(attn, axis=-1)
    attn = attn * m
    out = jnp.einsum("bhqk,bhkd->bhqd", attn, v)
    out = out.transpose(0, 2, 1, 3).reshape(bsz, n, c)
    out = out @ params["proj_w"] + params["proj_b"]
    x = x + scales1[:, None, None].astype(x.dtype) * out
    h2 = ln(x, params["norm2_g"], params["norm2_b"])
    h2 = jax.nn.gelu(h2 @ params["fc1_w"] + params["fc1_b"], approximate=True)
    h2 = h2 @ params["fc2_w"] + params["fc2_b"]
    x = x + scales2[:, None, None].astype(x.dtype) * h2
    return x


# ----------------------------------------------------------------- demo / self-check
if __name__ == "__main__":
    root = jax.random.PRNGKey(0)
    k_x, k_p, k_dp1, k_dp2 = jax.random.split(root, 4)

    B, N, DIM, HEADS = 2, 8, 32, 4
    DROP_PATH_PROB = 0.1

    x = jax.random.normal(k_x, (B, N, DIM), dtype=jnp.float32)

    # Deterministic part mask: tokens attend within their part (size 4) + global token 0.
    part = jnp.arange(N) // 4
    mask = (part[:, None] == part[None, :]).astype(jnp.float32)
    mask = mask.at[:, 0].set(1.0)

    params = init_params(k_p, DIM, HEADS, mlp_ratio=4.0, qkv_bias=False)

    # Per-sample stochastic-depth scales computed in the wrapper (training mode),
    # shared with the reference so the comparison is apples-to-apples.
    scales1 = make_drop_path_scales(k_dp1, B, DROP_PATH_PROB, training=True)
    scales2 = make_drop_path_scales(k_dp2, B, DROP_PATH_PROB, training=True)

    out = part_attention_block_forward(params, x, mask, num_heads=HEADS,
                                       scales1=scales1, scales2=scales2)
    out = jax.block_until_ready(out)

    ref = reference_forward(params, x, mask, num_heads=HEADS,
                            scales1=scales1, scales2=scales2)

    assert out.shape == x.shape
    assert bool(jnp.all(jnp.isfinite(out)))
    max_err = float(jnp.max(jnp.abs(out - ref)))
    # bf16 MXU operands vs f32 reference -> moderate tolerance
    assert bool(jnp.allclose(out, ref, atol=1e-1, rtol=1e-1)), f"max_err={max_err}"

    print("KERNEL_OK")
</pallas_src>

<mosaic_0001>
module attributes {stable_mosaic.version = 11 : i64} {
  func.func @_ln_linear_kernel(%arg0: i32, %arg1: i32, %arg2: memref<16x32xf32, #tpu.memory_space<vmem>>, %arg3: memref<1x32xf32, #tpu.memory_space<vmem>>, %arg4: memref<1x32xf32, #tpu.memory_space<vmem>>, %arg5: memref<32x96xbf16, #tpu.memory_space<vmem>>, %arg6: memref<1x96xf32, #tpu.memory_space<vmem>>, %arg7: memref<16x96xbf16, #tpu.memory_space<vmem>>) attributes {dimension_semantics = [#tpu.dimension_semantics<parallel>, #tpu.dimension_semantics<parallel>], iteration_bounds = array<i64: 1, 1>, scalar_prefetch = 0 : i64, scratch_operands = 0 : i64, tpu.core_type = #tpu.core_type<tc>, window_params = [{transform_indices = @transform_0, window_bounds = array<i64: 16, 32>}, {pipeline_mode = #tpu.pipeline_mode<synchronous>, transform_indices = @transform_1, window_bounds = array<i64: 1, 32>}, {pipeline_mode = #tpu.pipeline_mode<synchronous>, transform_indices = @transform_2, window_bounds = array<i64: 1, 32>}, {transform_indices = @transform_3, window_bounds = array<i64: 32, 96>}, {transform_indices = @transform_4, window_bounds = array<i64: 1, 96>}, {transform_indices = @transform_5, window_bounds = array<i64: 16, 96>}]} {
    %c0 = arith.constant 0 : index
    %c0_0 = arith.constant 0 : index
    %0 = vector.load %arg2[%c0, %c0_0] : memref<16x32xf32, #tpu.memory_space<vmem>>, vector<16x32xf32>
    %cst = arith.constant dense<0.000000e+00> : vector<16xf32>
    %1 = vector.multi_reduction <add>, %0, %cst [1] : vector<16x32xf32> to vector<16xf32>
    %2 = vector.shape_cast %1 : vector<16xf32> to vector<16x1xf32>
    %cst_1 = arith.constant 3.200000e+01 : f32
    %3 = vector.broadcast %cst_1 : f32 to vector<16x1xf32>
    %4 = arith.divf %2, %3 : vector<16x1xf32>
    %5 = vector.broadcast %4 : vector<16x1xf32> to vector<16x32xf32>
    %6 = arith.subf %0, %5 : vector<16x32xf32>
    %7 = arith.mulf %6, %6 : vector<16x32xf32>
    %cst_2 = arith.constant dense<0.000000e+00> : vector<16xf32>
    %8 = vector.multi_reduction <add>, %7, %cst_2 [1] : vector<16x32xf32> to vector<16xf32>
    %9 = vector.shape_cast %8 : vector<16xf32> to vector<16x1xf32>
    %cst_3 = arith.constant 3.200000e+01 : f32
    %10 = vector.broadcast %cst_3 : f32 to vector<16x1xf32>
    %11 = arith.divf %9, %10 : vector<16x1xf32>
    %cst_4 = arith.constant 9.99999974E-6 : f32
    %12 = vector.broadcast %cst_4 : f32 to vector<16x1xf32>
    %13 = arith.addf %11, %12 : vector<16x1xf32>
    %14 = math.rsqrt %13 : vector<16x1xf32>
    %15 = vector.broadcast %14 : vector<16x1xf32> to vector<16x32xf32>
    %16 = arith.mulf %6, %15 : vector<16x32xf32>
    %c0_5 = arith.constant 0 : index
    %c0_6 = arith.constant 0 : index
    %17 = vector.load %arg3[%c0_5, %c0_6] : memref<1x32xf32, #tpu.memory_space<vmem>>, vector<1x32xf32>
    %18 = vector.broadcast %17 : vector<1x32xf32> to vector<16x32xf32>
    %19 = arith.mulf %16, %18 : vector<16x32xf32>
    %c0_7 = arith.constant 0 : index
    %c0_8 = arith.constant 0 : index
    %20 = vector.load %arg4[%c0_7, %c0_8] : memref<1x32xf32, #tpu.memory_space<vmem>>, vector<1x32xf32>
    %21 = vector.broadcast %20 : vector<1x32xf32> to vector<16x32xf32>
    %22 = arith.addf %19, %21 : vector<16x32xf32>
    %23 = arith.truncf %22 : vector<16x32xf32> to vector<16x32xbf16>
    %c0_9 = arith.constant 0 : index
    %c0_10 = arith.constant 0 : index
    %24 = vector.load %arg5[%c0_9, %c0_10] : memref<32x96xbf16, #tpu.memory_space<vmem>>, vector<32x96xbf16>
    %cst_11 = arith.constant dense<0.000000e+00> : vector<16x96xf32>
    %25 = tpu.matmul %23, %24, %cst_11 {dimension_numbers = #tpu.dot_dimension_numbers<[1], [0], [0], [1], [0, 0, 1, 1], [], []>} : vector<16x32xbf16>, vector<32x96xbf16>, vector<16x96xf32> -> vector<16x96xf32>
    %c0_12 = arith.constant 0 : index
    %c0_13 = arith.constant 0 : index
    %26 = vector.load %arg6[%c0_12, %c0_13] : memref<1x96xf32, #tpu.memory_space<vmem>>, vector<1x96xf32>
    %27 = vector.broadcast %26 : vector<1x96xf32> to vector<16x96xf32>
    %28 = arith.addf %25, %27 : vector<16x96xf32>
    %29 = arith.truncf %28 : vector<16x96xf32> to vector<16x96xbf16>
    %c0_14 = arith.constant 0 : index
    %c0_15 = arith.constant 0 : index
    %30 = vector.load %arg7[%c0_14, %c0_15] : memref<16x96xbf16, #tpu.memory_space<vmem>>, vector<16x96xbf16>
    tpu.vector_store %arg7[%c0_14, %c0_15], %29 {strides = array<i32>} : memref<16x96xbf16, #tpu.memory_space<vmem>>, vector<16x96xbf16>,
    return
  }
  func.func @transform_0(%arg0: i32, %arg1: i32) -> (i32, i32) {
    %c0_i32 = arith.constant 0 : i32
    %c0_i32_0 = arith.constant 0 : i32
    return %arg0, %c0_i32 : i32, i32
  }
  func.func @transform_1(%arg0: i32, %arg1: i32) -> (i32, i32) {
    %c0_i32 = arith.constant 0 : i32
    %c0_i32_0 = arith.constant 0 : i32
    %c0_i32_1 = arith.constant 0 : i32
    return %c0_i32, %c0_i32_0 : i32, i32
  }
  func.func @transform_2(%arg0: i32, %arg1: i32) -> (i32, i32) {
    %c0_i32 = arith.constant 0 : i32
    %c0_i32_0 = arith.constant 0 : i32
    %c0_i32_1 = arith.constant 0 : i32
    return %c0_i32, %c0_i32_0 : i32, i32
  }
  func.func @transform_3(%arg0: i32, %arg1: i32) -> (i32, i32) {
    %c0_i32 = arith.constant 0 : i32
    %c0_i32_0 = arith.constant 0 : i32
    return %c0_i32, %arg1 : i32, i32
  }
  func.func @transform_4(%arg0: i32, %arg1: i32) -> (i32, i32) {
    %c0_i32 = arith.constant 0 : i32
    %c0_i32_0 = arith.constant 0 : i32
    return %c0_i32, %arg1 : i32, i32
  }
  func.func @transform_5(%arg0: i32, %arg1: i32) -> (i32, i32) {
    %c0_i32 = arith.constant 0 : i32
    return %arg0, %arg1 : i32, i32
  }
}

</mosaic_0001>

<bundles_post_ra>
// kernel: tpu_custom_call.1
= control target key start
LH: loop header
LB: loop body
LE: loop exit
PB: predicated region body
PF: predicated region fallthrough
CT: control target
= control target key end

     0   :  { %10 = vsyncpa [#allocation3], 0  ;;  %s398_s0 = inlined_call_operand.hbm [shape: f32[16,32], index: 0, kind: input, shape index: {}]   ;;  %s399_s1 = inlined_call_operand.vmem [shape: f32[1,32], index: 1, kind: input, shape index: {}]   ;;  %s400_s2 = inlined_call_operand.vmem [shape: f32[1,32], index: 2, kind: input, shape index: {}]   ;;  %s401_s3 = inlined_call_operand.hbm [shape: bf16[32,96], index: 3, kind: input, shape index: {}]   ;;  %s402_s4 = inlined_call_operand.vmem [shape: f32[1,96], index: 4, kind: input, shape index: {}]   ;;  %s403_s5 = inlined_call_operand.hbm [shape: bf16[16,96], index: 5, kind: output, shape index: {}]  }
   0x1   :  { %11 = vsyncpa [#allocation6], 0 }
   0x2   :  { %12 = vsyncpa [#allocation4], 0  ;;  %s303_s18 = smov [#allocation2]   ;;  %s231_s22 = scalar_lea.hbm %s398_s0, 256 }
   0x3   :  { %s18_s19 = sshll.u32 %s303_s18, 4  ;;  %p232_p0 = scmp.ne.s32.totalorder %s398_s0, %s231_s22  ;;  %s19_s19 = int_to_ptr.vmem [resolvable:$true] %s18_s19 }
   0x4   :  { %p235_p1 = scmp.lt.u32.totalorder %s231_s22, %s398_s0 }
   0x6   :  { %p237_p2 = pnand %p235_p1, %p232_p0 }
   0x8   :  { %240 = shalt.err (!%p237_p2)
}
   0x9   :  { %s241_s27 = scalar_lea.vmem %s19_s19, 256  ;;  %p246_p4 = scmp.lt.s32.totalorder %s19_s19, %s19_s19 }
   0xa   :  { %p242_p3 = scmp.ne.s32.totalorder %s19_s19, %s241_s27  ;;  %p247_p5 = scmp.lt.s32.totalorder %s241_s27, %s241_s27 }
   0xc   :  { %p248_p6 = por %p247_p5, %p246_p4 }
   0xe   :  { %p249_p7 = pnand %p248_p6, %p242_p3 }
  0x10   :  { %252 = shalt.err (!%p249_p7)
}
  0x11   :  { %s304_s28 = smov 128   ;;  %s305_s29 = smov 8  }
  0x12   :  { %24 = dma.hbm_to_vmem [thread:$0]  %s398_s0, 256, %s19_s19, [#allocation3], %s304_s28, %s304_s28, %s305_s29  }
  0x13   :  { %s306_s7 = smov [#allocation5]   ;;  %s253_s11 = scalar_lea.hbm %s401_s3, 256 }
  0x14   :  { %s34_s8 = sshll.u32 %s306_s7, 4  ;;  %p254_p8 = scmp.ne.s32.totalorder %s401_s3, %s253_s11  ;;  %s35_s8 = int_to_ptr.vmem [resolvable:$true] %s34_s8 }
  0x15   :  { %p257_p9 = scmp.lt.u32.totalorder %s253_s11, %s401_s3 }
  0x17   :  { %p259_p10 = pnand %p257_p9, %p254_p8 }
  0x19   :  { %262 = shalt.err (!%p259_p10)
}
  0x1a   :  { %s263_s16 = scalar_lea.vmem %s35_s8, 256  ;;  %p268_p12 = scmp.lt.s32.totalorder %s35_s8, %s35_s8 }
  0x1b   :  { %p264_p11 = scmp.ne.s32.totalorder %s35_s8, %s263_s16  ;;  %p269_p13 = scmp.lt.s32.totalorder %s263_s16, %s263_s16 }
  0x1d   :  { %p270_p0 = por %p269_p13, %p268_p12 }
  0x1f   :  { %p271_p1 = pnand %p270_p0, %p264_p11 }
  0x21   :  { %274 = shalt.err (!%p271_p1)
}
  0x22   :  { %s307_s0 = smov 64   ;;  %s308_s17 = smov 4  }
  0x23   :  { %40 = dma.hbm_to_vmem [thread:$0]  %s401_s3, 256, %s35_s8, [#allocation6], %s307_s0, %s307_s0, %s308_s17  }
  0x24   :  { %297 = dma.done.wait [#allocation3], 256  }
  0x25   :  { %298 = vsyncadd [#allocation3], 4294967040 }
  0x26   :  { %299 = dma.done.wait [#allocation6], 256  }
  0x27   :  { %300 = vsyncadd [#allocation6], 4294967040  ;;  %vm52_vm0 = vcmask 261120   ;;  %v50_v0 = vld [vmem:[#allocation2] sm:$0xff]  ;;  %v51_v1 = vld [vmem:[#allocation2 + $0x8] sm:$0xff]  ;;  %v309_v15 = vmov 0.0  }
  0x28   :  { %v53_v2 = vsel %vm52_vm0, %v50_v0, 0.0  ;;  %v56_v3 = vsel %vm52_vm0, %v51_v1, 0.0  ;;  %v225_v14 = vld [vmem:[#allocation5] sm:$0xff]   ;;  %208 = vmatprep.subr.bf16.mxu0 %v309_v15  ;;  %v226_v16 = vld [vmem:[#allocation5 + $0x8] sm:$0xff]   ;;  %vm310_vm1 = vmmov 0   ;;  %vm174_vm2 = vcmask 781312  }
  0x29   :  { %54 = vadd.xlane.f32.xlu0 %v53_v2  ;;  %209 = vmatpush3.bf16.msra.mxu0 %v225_v14  ;;  %v195_v25 = vld [vmem:[%s399_s1] ss:$0 sm:$0xff]  ;;  %s311_s1 = smov [#allocation7]  }
  0x2a   :  { %212 = vmatprep.mubr.msk.bf16.mxu0 %vm310_vm1, %v309_v15  ;;  %210 = vmatprep.subr.bf16.mxu0 %v309_v15  ;;  %v196_v29 = vld [vmem:[%s400_s2] ss:$0 sm:$0xff]  ;;  %s182_s25 = sshll.u32 %s311_s1, 4  ;;  %s183_s25 = int_to_ptr.vmem [resolvable:$true] %s182_s25 }
  0x2b   :  { %v197_v34 = vld [vmem:[%s402_s4] ss:$0 sm:$0xff]  ;;  %s275_s2 = scalar_lea.vmem %s183_s25, 128  ;;  %p280_p3 = scmp.lt.s32.totalorder %s183_s25, %s183_s25 }
  0x2c   :  { %p276_p2 = scmp.ne.s32.totalorder %s183_s25, %s275_s2  ;;  %p281_p4 = scmp.lt.s32.totalorder %s275_s2, %s275_s2 }
  0x2d   :  { %57 = vadd.xlane.f32.xlu0 %v56_v3  ;;  %211 = vmatpush3.bf16.msra.mxu0 %v226_v16 }
  0x2e   :  { %p282_p5 = por %p281_p4, %p280_p3 }
  0x30   :  { %p283_p6 = pnand %p282_p5, %p276_p2 }
  0xb6   :  { %v55_v4 = vpop.xlane.xlu0 %54 }
  0xb7   :  { %v60_v5 = vmul.f32 0.03125, %v55_v4 }
  0xb9   :  { %v62_v6 = vsub.f32 %v50_v0, %v60_v5 }
  0xba   :  { %v58_v7 = vpop.xlane.xlu0 %57 }
  0xbb   :  { %v61_v8 = vmul.f32 0.03125, %v58_v7  ;;  %v64_v9 = vmul.f32 %v62_v6, %v62_v6 }
  0xbd   :  { %v63_v10 = vsub.f32 %v51_v1, %v61_v8  ;;  %v66_v11 = vsel %vm52_vm0, %v64_v9, 0.0 }
  0xbe   :  { %67 = vadd.xlane.f32.xlu1 %v66_v11 }
  0xbf   :  { %v65_v12 = vmul.f32 %v63_v10, %v63_v10 }
  0xc1   :  { %v69_v13 = vsel %vm52_vm0, %v65_v12, 0.0 }
  0xc2   :  { %70 = vadd.xlane.f32.xlu1 %v69_v13 }
 0x14b   :  { %v68_v17 = vpop.xlane.xlu1 %67 }
 0x14c   :  { %v72_v18 = vmul.f32 0.03125, %v68_v17 }
 0x14e   :  { %v74_v19 = vadd.f32 1e-05, %v72_v18 }
 0x14f   :  { %v71_v20 = vpop.xlane.xlu1 %70 }
 0x150   :  { %227 = vrsqrt.f32 %v74_v19  ;;  %v73_v21 = vmul.f32 0.03125, %v71_v20 }
 0x152   :  { %v75_v22 = vadd.f32 1e-05, %v73_v21 }
 0x154   :  { %229 = vrsqrt.f32 %v75_v22 }
 0x15a   :  { %v228_v23 = vpop.eup %227 }
 0x15b   :  { %v78_v24 = vmul.f32 %v228_v23, %v62_v6 }
 0x15d   :  { %v87_v28 = vmul.f32 %v195_v25, %v78_v24 }
 0x15e   :  { %v230_v26 = vpop.eup %229 }
 0x15f   :  { %v79_v27 = vmul.f32 %v230_v26, %v63_v10  ;;  %v96_v31 = vadd.f32 %v196_v29, %v87_v28 }
 0x161   :  { %v88_v30 = vmul.f32 %v195_v25, %v79_v27 }
 0x163   :  { %v97_v32 = vadd.f32 %v196_v29, %v88_v30 }
 0x165   :  { %v98_v33 = vpack.c.bf16 %v97_v32, %v96_v31 }
 0x167   :  { %213 = vmatmul.mubr.msk.bf16.vlgmr.msra.gmra.mrb[0].mxu0 %vm52_vm0, %v98_v33 }
 0x23a   :  { %v159_v35 = vpop.f32.mrb[0].mxu0 }
 0x23b   :  { %v160_v36 = vadd.f32 %v197_v34, %v159_v35  ;;  %v214_v37 = vpop.f32.mrb[1].mxu0 }
 0x23c   :  { %v162_v38 = vpop.f32.mrb[2].mxu0 }
 0x23d   :  { %v203_v39 = vpack.c.bf16 %v160_v36, %v160_v36  ;;  %v163_v40 = vadd.f32 %v197_v34, %v162_v38  ;;  %v215_v41 = vpop.f32.mrb[3].mxu0 }
 0x23f   :  { %v204_v42 = vpack.c.bf16 %v163_v40, %v163_v40  ;;  %175 = vst.msk [vmem:[#allocation7] sm:$0xf] %vm174_vm2, %v203_v39 }
 0x241   :  { %176 = vst.msk [vmem:[#allocation7 + $0x4] sm:$0xf] %vm174_vm2, %v204_v42 }
 0x242   :  { %286 = shalt.err (!%p283_p6)
}
 0x243   :  { %s287_s27 = scalar_lea.hbm %s403_s5, 128 }
 0x244   :  { %p288_p7 = scmp.ne.s32.totalorder %s403_s5, %s287_s27  ;;  %p291_p8 = scmp.lt.u32.totalorder %s287_s27, %s403_s5 }
 0x246   :  { %p293_p9 = pnand %p291_p8, %p288_p7 }
 0x248   :  { %296 = shalt.err (!%p293_p9)
}
 0x249   :  { %188 = dma.vmem_to_hbm [thread:$0]  %s183_s25, 128, %s403_s5, [#allocation4], %s307_s0, %s307_s0, %s308_s17  }
 0x24a   :  { %301 = dma.done.wait [#allocation4], 128  }
 0x24b   :  { %302 = vsyncadd [#allocation4], 4294967168 }
 0x24c   :  { %192 = vsyncpa [#allocation3], 1 }
 0x24d   :  { %193 = vsyncpa [#allocation6], 1 }
 0x24e   :  { %194 = vsyncpa [#allocation4], 1 }

</bundles_post_ra>
